<compile_context>
chip_gen: v5e
topology: v5e:2x2
jax: 0.10.0
libtpu: 0.0.40
codegen_flags: <defaults>
</compile_context>

<pallas_src>
import jax
import jax.numpy as jnp
from jax.experimental import pallas as pl
from jax.experimental.pallas import tpu as pltpu


def _linear_kernel(x_ref, w_ref, b_ref, o_ref):
    # x_ref: (tm, F) bf16   w_ref: (F, O) bf16   b_ref: (1, O) f32   o_ref: (tm, O)
    acc = jnp.dot(x_ref[...], w_ref[...], preferred_element_type=jnp.float32)
    acc = acc + b_ref[...]                      # bias broadcasts over the row tile
    o_ref[...] = acc.astype(o_ref.dtype)


def _round_up(n, m):
    return ((n + m - 1) // m) * m


def linear_neck(x, w, b, *, tm=256, use_bf16=True, vmem_limit_bytes=None):
    """PyTorch LinearNeck forward: y = x @ w.T + b (applied to the last dim of x).

    x: (..., F)            activations
    w: (O, F)              nn.Linear weight (PyTorch layout)
    b: (O,)                nn.Linear bias
    tm:                    row tile (128 / 256 / 512); clamped to the padded batch.
    returns (..., O) in x.dtype.
    """
    orig_shape = x.shape
    F = orig_shape[-1]
    O = w.shape[0]
    out_dtype = x.dtype

    # nn.Linear semantics: flatten all leading dims into one row axis.
    x2 = x.reshape(-1, F)
    N = x2.shape[0]

    # One-time transpose so the kernel does a plain x @ W on the MXU.
    w_t = jnp.transpose(w)

    # bf16 MXU inputs, f32 accumulation (negligible accuracy loss for a neck).
    mm_dtype = jnp.bfloat16 if use_bf16 else x.dtype
    x_mm = x2.astype(mm_dtype)
    w_mm = w_t.astype(mm_dtype)
    b2 = b.reshape(1, O).astype(jnp.float32)

    # Clamp the row tile to the sublane-padded batch (never > rows we actually have),
    # then pad the batch to a multiple of the effective tile.
    tm_eff = min(tm, _round_up(N, 8))
    grid_m = pl.cdiv(N, tm_eff)
    n_pad = grid_m * tm_eff
    if n_pad != N:
        x_mm = jnp.pad(x_mm, ((0, n_pad - N), (0, 0)))

    cp_kwargs = dict(dimension_semantics=("parallel",))
    if vmem_limit_bytes is not None:
        cp_kwargs["vmem_limit_bytes"] = vmem_limit_bytes

    out = pl.pallas_call(
        _linear_kernel,
        out_shape=jax.ShapeDtypeStruct((n_pad, O), out_dtype),
        grid_spec=pltpu.PrefetchScalarGridSpec(
            num_scalar_prefetch=0,
            grid=(grid_m,),
            in_specs=[
                pl.BlockSpec((tm_eff, F), lambda i: (i, 0)),  # x row-tile (pipelined)
                pl.BlockSpec((F, O), lambda i: (0, 0)),       # W resident (constant index)
                pl.BlockSpec((1, O), lambda i: (0, 0)),       # bias resident
            ],
            out_specs=pl.BlockSpec((tm_eff, O), lambda i: (i, 0)),  # lane-dense output
        ),
        compiler_params=pltpu.CompilerParams(**cp_kwargs),
    )(x_mm, w_mm, b2)

    if n_pad != N:
        out = out[:N]
    return out.reshape(orig_shape[:-1] + (O,))


def linear_neck_ref(x, w, b):
    return x @ w.T + b


if __name__ == "__main__":
    # Small shapes consistent with the module (num_features=2048, num_out=128 in the
    # original — scaled down here).  N is deliberately not a multiple of the row tile
    # to exercise the padded-tail path; a 3-D input exercises the leading-dim flatten.
    F, O = 256, 128
    key = jax.random.PRNGKey(0)
    kx, kw, kb, kx3 = jax.random.split(key, 4)

    w = jax.random.normal(kw, (O, F), dtype=jnp.float32) * (1.0 / jnp.sqrt(F))
    b = jax.random.normal(kb, (O,), dtype=jnp.float32) * 0.01

    # 2-D input (the usual neck input: (batch, features)).
    x = jax.random.normal(kx, (10, F), dtype=jnp.float32)
    out = jax.block_until_ready(linear_neck(x, w, b))
    ref = linear_neck_ref(x, w, b)
    assert out.shape == (10, O)
    # Loose-ish tolerance: kernel runs the matmul with bf16 inputs (f32 accumulation).
    assert jnp.allclose(out, ref, atol=2e-2, rtol=2e-2), "2D mismatch vs reference"

    # 3-D input (nn.Linear applies to the last dim).
    x3 = jax.random.normal(kx3, (2, 5, F), dtype=jnp.float32)
    out3 = jax.block_until_ready(linear_neck(x3, w, b))
    ref3 = linear_neck_ref(x3, w, b)
    assert out3.shape == (2, 5, O)
    assert jnp.allclose(out3, ref3, atol=2e-2, rtol=2e-2), "3D mismatch vs reference"

    print("KERNEL_OK")
</pallas_src>

<mosaic_0001>
module attributes {stable_mosaic.version = 11 : i64} {
  func.func @_linear_kernel(%arg0: i32, %arg1: memref<16x256xbf16, #tpu.memory_space<vmem>>, %arg2: memref<256x128xbf16, #tpu.memory_space<vmem>>, %arg3: memref<1x128xf32, #tpu.memory_space<vmem>>, %arg4: memref<16x128xf32, #tpu.memory_space<vmem>>) attributes {dimension_semantics = [#tpu.dimension_semantics<parallel>], iteration_bounds = array<i64: 1>, scalar_prefetch = 0 : i64, scratch_operands = 0 : i64, tpu.core_type = #tpu.core_type<tc>, window_params = [{transform_indices = @transform_0, window_bounds = array<i64: 16, 256>}, {pipeline_mode = #tpu.pipeline_mode<synchronous>, transform_indices = @transform_1, window_bounds = array<i64: 256, 128>}, {pipeline_mode = #tpu.pipeline_mode<synchronous>, transform_indices = @transform_2, window_bounds = array<i64: 1, 128>}, {transform_indices = @transform_3, window_bounds = array<i64: 16, 128>}]} {
    %c0 = arith.constant 0 : index
    %c0_0 = arith.constant 0 : index
    %0 = vector.load %arg1[%c0, %c0_0] : memref<16x256xbf16, #tpu.memory_space<vmem>>, vector<16x256xbf16>
    %c0_1 = arith.constant 0 : index
    %c0_2 = arith.constant 0 : index
    %1 = vector.load %arg2[%c0_1, %c0_2] : memref<256x128xbf16, #tpu.memory_space<vmem>>, vector<256x128xbf16>
    %cst = arith.constant dense<0.000000e+00> : vector<16x128xf32>
    %2 = tpu.matmul %0, %1, %cst {dimension_numbers = #tpu.dot_dimension_numbers<[1], [0], [0], [1], [0, 0, 1, 1], [], []>} : vector<16x256xbf16>, vector<256x128xbf16>, vector<16x128xf32> -> vector<16x128xf32>
    %c0_3 = arith.constant 0 : index
    %c0_4 = arith.constant 0 : index
    %3 = vector.load %arg3[%c0_3, %c0_4] : memref<1x128xf32, #tpu.memory_space<vmem>>, vector<1x128xf32>
    %4 = vector.broadcast %3 : vector<1x128xf32> to vector<16x128xf32>
    %5 = arith.addf %2, %4 : vector<16x128xf32>
    %c0_5 = arith.constant 0 : index
    %c0_6 = arith.constant 0 : index
    %6 = vector.load %arg4[%c0_5, %c0_6] : memref<16x128xf32, #tpu.memory_space<vmem>>, vector<16x128xf32>
    tpu.vector_store %arg4[%c0_5, %c0_6], %5 {strides = array<i32>} : memref<16x128xf32, #tpu.memory_space<vmem>>, vector<16x128xf32>,
    return
  }
  func.func @transform_0(%arg0: i32) -> (i32, i32) {
    %c0_i32 = arith.constant 0 : i32
    %c0_i32_0 = arith.constant 0 : i32
    return %arg0, %c0_i32 : i32, i32
  }
  func.func @transform_1(%arg0: i32) -> (i32, i32) {
    %c0_i32 = arith.constant 0 : i32
    %c0_i32_0 = arith.constant 0 : i32
    %c0_i32_1 = arith.constant 0 : i32
    return %c0_i32, %c0_i32_0 : i32, i32
  }
  func.func @transform_2(%arg0: i32) -> (i32, i32) {
    %c0_i32 = arith.constant 0 : i32
    %c0_i32_0 = arith.constant 0 : i32
    %c0_i32_1 = arith.constant 0 : i32
    return %c0_i32, %c0_i32_0 : i32, i32
  }
  func.func @transform_3(%arg0: i32) -> (i32, i32) {
    %c0_i32 = arith.constant 0 : i32
    %c0_i32_0 = arith.constant 0 : i32
    return %arg0, %c0_i32 : i32, i32
  }
}

</mosaic_0001>

<bundles_post_ra>
// kernel: tpu_custom_call.1
= control target key start
LH: loop header
LB: loop body
LE: loop exit
PB: predicated region body
PF: predicated region fallthrough
CT: control target
= control target key end

     0   :  { %8 = vsyncpa [#allocation3], 0  ;;  %s462_s0 = inlined_call_operand.hbm [shape: bf16[16,256], index: 0, kind: input, shape index: {}]   ;;  %s463_s1 = inlined_call_operand.hbm [shape: bf16[256,128], index: 1, kind: input, shape index: {}]   ;;  %s464_s2 = inlined_call_operand.vmem [shape: f32[1,128], index: 2, kind: input, shape index: {}]   ;;  %s465_s3 = inlined_call_operand.hbm [shape: f32[16,128], index: 3, kind: output, shape index: {}]  }
   0x1   :  { %9 = vsyncpa [#allocation6], 0 }
   0x2   :  { %10 = vsyncpa [#allocation4], 0  ;;  %s15_s14 = sshll.u32 %s462_s0, 4  ;;  %s417_s15 = smov [#allocation2]   ;;  %s16_s14 = int_to_ptr.hbm [resolvable:$true] %s15_s14 }
   0x3   :  { %s17_s16 = sshll.u32 %s417_s15, 4  ;;  %s28_s19 = sshll.u32 %s463_s1, 4  ;;  %s18_s16 = int_to_ptr.vmem [resolvable:$true] %s17_s16  ;;  %s29_s19 = int_to_ptr.hbm [resolvable:$true] %s28_s19 }
   0x4   :  { %s418_s20 = smov 128   ;;  %s419_s21 = smov 8  }
   0x5   :  { %23 = dma.hbm_to_vmem [thread:$0]  %s16_s14, 256, %s18_s16, [#allocation3], %s418_s20, %s418_s20, %s419_s21  }
   0x6   :  { %s420_s22 = smov [#allocation5]   ;;  %s421_s24 = smov 64  }
   0x7   :  { %s30_s23 = sshll.u32 %s420_s22, 4  ;;  %s422_s0 = smov 4   ;;  %s31_s23 = int_to_ptr.vmem [resolvable:$true] %s30_s23 }
   0x8   :  { %36 = dma.hbm_to_vmem [thread:$0]  %s29_s19, 2048, %s31_s23, [#allocation6], %s421_s24, %s421_s24, %s422_s0  }
   0x9   :  { %411 = dma.done.wait [#allocation3], 256  }
   0xa   :  { %412 = vsyncadd [#allocation3], 4294967040 }
   0xb   :  { %413 = dma.done.wait [#allocation6], 2048  }
   0xc   :  { %414 = vsyncadd [#allocation6], 4294965248  ;;  %v322_v0 = vld [vmem:[#allocation5 + $0x38] sm:$0xff]  ;;  %v321_v2 = vld [vmem:[#allocation5 + $0x30] sm:$0xff]  ;;  %s423_s26 = smov [#allocation7]   ;;  %s227_s30 = sshll.u32 %s465_s3, 4  ;;  %s228_s30 = int_to_ptr.hbm [resolvable:$true] %s227_s30 }
   0xd   :  { %v330_v1 = vld [vmem:[#allocation5 + $0x78] sm:$0xff]  ;;  %191 = vmatpush.bf16.msra.mxu0 %v322_v0  ;;  %v329_v3 = vld [vmem:[#allocation5 + $0x70] sm:$0xff]  ;;  %v320_v4 = vld [vmem:[#allocation5 + $0x28] sm:$0xff]  ;;  %s225_s27 = sshll.u32 %s423_s26, 4  ;;  %s226_s27 = int_to_ptr.vmem [resolvable:$true] %s225_s27 }
   0xe   :  { %205 = vmatpush.bf16.msra.mxu1 %v330_v1  ;;  %v328_v5 = vld [vmem:[#allocation5 + $0x68] sm:$0xff]  ;;  %v319_v6 = vld [vmem:[#allocation5 + $0x20] sm:$0xff]  ;;  %v318_v8 = vld [vmem:[#allocation5 + $0x18] sm:$0xff] }
   0xf   :  { %v327_v7 = vld [vmem:[#allocation5 + $0x60] sm:$0xff]  ;;  %v326_v9 = vld [vmem:[#allocation5 + $0x58] sm:$0xff]  ;;  %v317_v10 = vld [vmem:[#allocation5 + $0x10] sm:$0xff] }
  0x10   :  { %v325_v11 = vld [vmem:[#allocation5 + $0x50] sm:$0xff]  ;;  %v316_v12 = vld [vmem:[#allocation5 + $0x8] sm:$0xff]  ;;  %v315_v14 = vld [vmem:[#allocation5] sm:$0xff] }
  0x11   :  { %192 = vmatpush.bf16.msra.mxu0 %v321_v2  ;;  %v324_v13 = vld [vmem:[#allocation5 + $0x48] sm:$0xff]  ;;  %v323_v15 = vld [vmem:[#allocation5 + $0x40] sm:$0xff]  ;;  %v243_v16 = vld [vmem:[#allocation2] sm:$0xf] }
  0x12   :  { %206 = vmatpush.bf16.msra.mxu1 %v329_v3  ;;  %v314_v17 = vld [vmem:[#allocation2 + $0x4] sm:$0xf0]  ;;  %v313_v18 = vld [vmem:[#allocation2 + $0x4] sm:$0xf]  ;;  %v245_v19 = vld [vmem:[#allocation2 + $0x8] sm:$0xf0] }
  0x13   :  { %v244_v20 = vor.u32 %v314_v17, %v243_v16  ;;  %v248_v21 = vor.u32 %v313_v18, %v245_v19  ;;  %v338_v22 = vld [vmem:[%s464_s2] ss:$0 sm:$0xff] }
  0x15   :  { %193 = vmatpush.bf16.msra.mxu0 %v320_v4 }
  0x16   :  { %207 = vmatpush.bf16.msra.mxu1 %v328_v5 }
  0x19   :  { %194 = vmatpush.bf16.msra.mxu0 %v319_v6 }
  0x1a   :  { %208 = vmatpush.bf16.msra.mxu1 %v327_v7 }
  0x1d   :  { %195 = vmatpush.bf16.msra.mxu0 %v318_v8 }
  0x1e   :  { %209 = vmatpush.bf16.msra.mxu1 %v326_v9 }
  0x21   :  { %196 = vmatpush.bf16.msra.mxu0 %v317_v10 }
  0x22   :  { %210 = vmatpush.bf16.msra.mxu1 %v325_v11 }
  0x25   :  { %197 = vmatpush.bf16.msra.mxu0 %v316_v12 }
  0x26   :  { %211 = vmatpush.bf16.msra.mxu1 %v324_v13 }
  0x29   :  { %198 = vmatpush.bf16.msra.mxu0 %v315_v14 }
  0x2a   :  { %212 = vmatpush.bf16.msra.mxu1 %v323_v15 }
  0x2c   :  { %199 = vmatmul.bf16.vlgmr.msra.gmra.mxu0 %v244_v20 }
  0x2d   :  { %213 = vmatmul.bf16.vlgmr.msra.gmra.mxu1 %v248_v21 }
  0xa9   :  { %v200_v23 = vpop.f32.mrf.mxu0 }
  0xaa   :  { %v214_v24 = vpop.f32.mrf.mxu1  ;;  %v201_v25 = vadd.f32 %v338_v22, %v200_v23 }
  0xac   :  { %v215_v26 = vadd.f32 %v214_v24, %v201_v25 }
  0xae   :  { %219 = vst [vmem:[#allocation7] sm:$0xff] %v215_v26 }
  0xb1   :  { %v202_v27 = vpop.f32.mrf.mxu0 }
  0xb2   :  { %v203_v28 = vadd.f32 %v338_v22, %v202_v27  ;;  %v216_v29 = vpop.f32.mrf.mxu1 }
  0xb4   :  { %v217_v30 = vadd.f32 %v216_v29, %v203_v28 }
  0xb6   :  { %220 = vst [vmem:[#allocation7 + $0x8] sm:$0xff] %v217_v30 }
  0xb7   :  { %233 = dma.vmem_to_hbm [thread:$0]  %s226_s27, 256, %s228_s30, [#allocation4], %s418_s20, %s418_s20, %s419_s21  }
  0xb8   :  { %415 = dma.done.wait [#allocation4], 256  }
  0xb9   :  { %416 = vsyncadd [#allocation4], 4294967040 }
  0xba   :  { %238 = vsyncpa [#allocation3], 1 }
  0xbb   :  { %239 = vsyncpa [#allocation6], 1 }
  0xbc   :  { %240 = vsyncpa [#allocation4], 1 }

</bundles_post_ra>
